<compile_context>
chip_gen: v7x
topology: tpu7x:2x2x1
jax: 0.10.0
libtpu: 0.0.40
codegen_flags: <defaults>
</compile_context>

<pallas_src>
import math

import numpy as np
import jax
import jax.numpy as jnp
from jax.experimental import pallas as pl
from jax.experimental.pallas import tpu as pltpu


# ---------------------------------------------------------------------------
# Kernels
# ---------------------------------------------------------------------------

def _masked_linear_bias_kernel(x_ref, w_ref, b_ref, o_ref, acc_ref):
    # x_ref : (tm, tk)  activation tile (compute dtype)
    # w_ref : (tk, tn)  pre-masked, K-major weight tile (compute dtype)
    # b_ref : (1, tn)   bias slice (f32)
    # o_ref : (tm, tn)  output tile (lane-dense, tn % 128 == 0)
    # acc_ref: (tm, tn) f32 accumulator, resident across the K grid axis
    k = pl.program_id(2)

    @pl.when(k == 0)
    def _():
        acc_ref[...] = jnp.zeros_like(acc_ref)

    acc_ref[...] += jnp.dot(x_ref[...], w_ref[...],
                            preferred_element_type=jnp.float32)

    @pl.when(k == pl.num_programs(2) - 1)
    def _():
        o_ref[...] = (acc_ref[...] + b_ref[...]).astype(o_ref.dtype)


def _masked_linear_nobias_kernel(x_ref, w_ref, o_ref, acc_ref):
    k = pl.program_id(2)

    @pl.when(k == 0)
    def _():
        acc_ref[...] = jnp.zeros_like(acc_ref)

    acc_ref[...] += jnp.dot(x_ref[...], w_ref[...],
                            preferred_element_type=jnp.float32)

    @pl.when(k == pl.num_programs(2) - 1)
    def _():
        o_ref[...] = acc_ref[...].astype(o_ref.dtype)


# ---------------------------------------------------------------------------
# Tiling helpers
# ---------------------------------------------------------------------------

def _round_up(x, m):
    return ((x + m - 1) // m) * m


def _cdiv(a, b):
    return (a + b - 1) // b


def _largest_div_mult128(n, cap):
    """Largest multiple-of-128 divisor of n that is <= cap (n % 128 == 0)."""
    best = 128
    t = 128
    while t <= min(cap, n):
        if n % t == 0:
            best = t
        t += 128
    return best


def _vmem_capacity_and_budget():
    cap = None
    try:
        info = pltpu.get_tpu_info()
        cap = getattr(info, "vmem_capacity_bytes", None)
    except Exception:
        cap = None
    if not cap or cap <= 0:
        cap = 64 << 20  # conservative fallback: v7x per-TC physical VMEM
    return cap, int(cap * 0.6)


def _footprint_bytes(tm, tn, tk, in_item, out_item):
    # Double-buffered inputs/outputs + single f32 accumulator.
    x_b = 2 * tm * tk * in_item
    w_b = 2 * tk * tn * in_item
    b_b = 2 * tn * 4
    o_b = 2 * tm * tn * out_item
    acc = tm * tn * 4
    return x_b + w_b + b_b + o_b + acc


# ---------------------------------------------------------------------------
# Wrapper
# ---------------------------------------------------------------------------

def network_activity_forward(x, weight, mask_oi, bias=None, *,
                             compute_dtype=jnp.bfloat16):
    """Masked linear forward: x @ (weight * mask_oi).T (+ bias).

    x       : (B, I) f32
    weight  : (O, I) f32
    mask_oi : (O, I) f32   (this is mask.T of the PyTorch (I, O) mask)
    bias    : (O,) f32 or None
    compute_dtype : dtype for the MXU operands (default bf16; accumulation is
                    always f32). Pass None for the exact f32 path that matches
                    PyTorch numerics bit-for-bit (up to f32 rounding).
    """
    B, I = x.shape
    O = weight.shape[0]
    out_dtype = x.dtype
    out_item = jnp.dtype(out_dtype).itemsize

    if compute_dtype is None:
        compute_dtype = x.dtype
    compute_dtype = jnp.dtype(compute_dtype)
    in_item = compute_dtype.itemsize

    # Loop-invariant masked weight (computed once), pre-transposed to K-major
    # (I, O) so the MXU sees a K-major RHS and the lane axis is padded O.
    w_masked = weight * mask_oi                          # (O, I) f32
    x_k = x.astype(compute_dtype)                        # (B, I)
    w_k = jnp.transpose(w_masked).astype(compute_dtype)  # (I, O)

    # ---- tile selection --------------------------------------------------
    sub = 16 if in_item == 2 else (32 if in_item == 1 else 8)

    # Batch tile: balanced across tiles (multiple of sublane packing, cap 256).
    n_m = max(1, _cdiv(B, 256))
    tm = min(256, _round_up(_cdiv(B, n_m), sub))
    b_pad = _round_up(B, tm)
    n_m = b_pad // tm

    # Output tile: lane-dense multiple of 128, cap 512.
    o_pad = _round_up(O, 128)
    tn = _largest_div_mult128(o_pad, 512)
    n_n = o_pad // tn

    # v7x has 2 TensorCores: guarantee >= 2 parallel grid steps when possible.
    if n_m * n_n < 2 and o_pad >= 256:
        tn = _largest_div_mult128(o_pad, o_pad - 128)
        n_n = o_pad // tn

    # K (=I) tile: largest multiple of 128 whose footprint fits the VMEM budget.
    vmem_cap, vmem_budget = _vmem_capacity_and_budget()
    i_pad0 = _round_up(I, 128)
    candidates = sorted({c for c in (i_pad0, 4096, 2048, 1024, 512, 256, 128)
                         if 128 <= c <= i_pad0}, reverse=True)
    tk = 128
    for c in candidates:
        if _footprint_bytes(tm, tn, c, in_item, out_item) <= vmem_budget:
            tk = c
            break
    i_pad = _round_up(I, tk)
    n_k = i_pad // tk

    # ---- padding -----------------------------------------------------------
    if b_pad != B or i_pad != I:
        x_k = jnp.pad(x_k, ((0, b_pad - B), (0, i_pad - I)))
    if i_pad != I or o_pad != O:
        w_k = jnp.pad(w_k, ((0, i_pad - I), (0, o_pad - O)))
    bias_row = None
    if bias is not None:
        bias_row = jnp.pad(bias.astype(jnp.float32),
                           (0, o_pad - O)).reshape(1, o_pad)

    # ---- grid-axis order: keep the bigger operand resident ----------------
    if n_k == 1:
        # Streamed element counts with a single K tile:
        batch_outer_traffic = b_pad * i_pad + n_m * o_pad * i_pad
        weight_outer_traffic = o_pad * i_pad + n_n * b_pad * i_pad
        batch_outer = batch_outer_traffic <= weight_outer_traffic
    else:
        batch_outer = True  # with K tiling, outer-axis order doesn't change traffic

    if batch_outer:
        grid = (n_m, n_n, n_k)
        x_map = lambda i, j, k: (i, k)
        w_map = lambda i, j, k: (k, j)
        b_map = lambda i, j, k: (0, j)
        o_map = lambda i, j, k: (i, j)
    else:
        grid = (n_n, n_m, n_k)
        x_map = lambda j, i, k: (i, k)
        w_map = lambda j, i, k: (k, j)
        b_map = lambda j, i, k: (0, j)
        o_map = lambda j, i, k: (i, j)

    x_spec = pl.BlockSpec((tm, tk), x_map)
    w_spec = pl.BlockSpec((tk, tn), w_map)
    out_spec = pl.BlockSpec((tm, tn), o_map)
    scratch = [pltpu.VMEM((tm, tn), jnp.float32)]

    fp = _footprint_bytes(tm, tn, tk, in_item, out_item)
    vmem_limit = int(min(max(fp * 5 // 4 + (1 << 20), 16 << 20), vmem_cap))
    vmem_limit = max(vmem_limit, fp + (1 << 20))
    cparams = pltpu.CompilerParams(
        dimension_semantics=("parallel", "parallel", "arbitrary"),
        vmem_limit_bytes=vmem_limit)

    cost = pl.CostEstimate(
        flops=2 * b_pad * i_pad * o_pad,
        transcendentals=0,
        bytes_accessed=(b_pad * i_pad * in_item + i_pad * o_pad * in_item
                        + b_pad * o_pad * out_item
                        + (o_pad * 4 if bias is not None else 0)))

    out_shape = jax.ShapeDtypeStruct((b_pad, o_pad), out_dtype)

    if bias is not None:
        b_spec = pl.BlockSpec((1, tn), b_map)
        out = pl.pallas_call(
            _masked_linear_bias_kernel,
            out_shape=out_shape,
            grid=grid,
            in_specs=[x_spec, w_spec, b_spec],
            out_specs=out_spec,
            scratch_shapes=scratch,
            compiler_params=cparams,
            cost_estimate=cost,
        )(x_k, w_k, bias_row)
    else:
        out = pl.pallas_call(
            _masked_linear_nobias_kernel,
            out_shape=out_shape,
            grid=grid,
            in_specs=[x_spec, w_spec],
            out_specs=out_spec,
            scratch_shapes=scratch,
            compiler_params=cparams,
            cost_estimate=cost,
        )(x_k, w_k)

    if b_pad != B or o_pad != O:
        out = out[:B, :O]
    return out


# ---------------------------------------------------------------------------
# Module construction helpers (mirror PyTorch __init__ / reset_parameters)
# ---------------------------------------------------------------------------

def build_mask_oi(input_size, output_size, relation_dict, lambda_parameter):
    """Build the mask directly in (O, I) layout (== mask.T of the PyTorch mask)."""
    m = np.full((output_size, input_size), lambda_parameter, dtype=np.float32)
    for i in range(input_size):
        for latent_idx in relation_dict.get(i, []):
            m[latent_idx, i] = 1.0
    return jnp.asarray(m)


def init_params(key, input_size, output_size, bias=True):
    # kaiming_uniform_(a=sqrt(5)) => bound = 1/sqrt(fan_in); bias uses same bound.
    kw, kb = jax.random.split(key)
    bound = 1.0 / math.sqrt(input_size)
    weight = jax.random.uniform(
        kw, (output_size, input_size), jnp.float32, minval=-bound, maxval=bound)
    b = (jax.random.uniform(kb, (output_size,), jnp.float32,
                            minval=-bound, maxval=bound) if bias else None)
    return weight, b


# ---------------------------------------------------------------------------
# Example / correctness check
# ---------------------------------------------------------------------------

if __name__ == "__main__":
    key = jax.random.PRNGKey(0)
    kx, kp = jax.random.split(key)

    B, INPUT_SIZE, OUTPUT_SIZE = 10, 96, 80
    LAMBDA = 0.1

    # Synthetic sparse relation dict: each input connects to two latents.
    relation_dict = {i: [i % OUTPUT_SIZE, (3 * i + 7) % OUTPUT_SIZE]
                     for i in range(INPUT_SIZE)}

    mask_oi = build_mask_oi(INPUT_SIZE, OUTPUT_SIZE, relation_dict, LAMBDA)  # (O, I)
    weight, bias = init_params(kp, INPUT_SIZE, OUTPUT_SIZE, bias=True)
    x = jax.random.normal(kx, (B, INPUT_SIZE), dtype=jnp.float32)

    ref = x @ (weight * mask_oi).T + bias
    ref_nb = x @ (weight * mask_oi).T

    # Default path: bf16 MXU operands, f32 accumulation (looser tolerance).
    out = jax.block_until_ready(network_activity_forward(x, weight, mask_oi, bias))
    assert out.shape == (B, OUTPUT_SIZE)
    assert jnp.allclose(out, ref, atol=2e-2, rtol=2e-2)

    # Opt-in exact f32 path (matches PyTorch numerics).
    out_f32 = jax.block_until_ready(
        network_activity_forward(x, weight, mask_oi, bias, compute_dtype=None))
    assert jnp.allclose(out_f32, ref, atol=1e-5, rtol=1e-5)

    # No-bias path (exact f32).
    out_nb = jax.block_until_ready(
        network_activity_forward(x, weight, mask_oi, None, compute_dtype=None))
    assert jnp.allclose(out_nb, ref_nb, atol=1e-5, rtol=1e-5)

    print("KERNEL_OK")
</pallas_src>

<mosaic_0001>
module attributes {stable_mosaic.version = 11 : i64} {
  func.func @_masked_linear_bias_kernel(%arg0: i32, %arg1: i32, %arg2: i32, %arg3: memref<16x128xbf16, #tpu.memory_space<vmem>>, %arg4: memref<128x128xbf16, #tpu.memory_space<vmem>>, %arg5: memref<1x128xf32, #tpu.memory_space<vmem>>, %arg6: memref<16x128xf32, #tpu.memory_space<vmem>>, %arg7: memref<16x128xf32, #tpu.memory_space<vmem>>) attributes {dimension_semantics = [#tpu.dimension_semantics<parallel>, #tpu.dimension_semantics<parallel>, #tpu.dimension_semantics<arbitrary>], iteration_bounds = array<i64: 1, 1, 1>, scalar_prefetch = 0 : i64, scratch_operands = 1 : i64, tpu.core_type = #tpu.core_type<tc>, window_params = [{transform_indices = @transform_0, window_bounds = array<i64: 16, 128>}, {transform_indices = @transform_1, window_bounds = array<i64: 128, 128>}, {transform_indices = @transform_2, window_bounds = array<i64: 1, 128>}, {transform_indices = @transform_3, window_bounds = array<i64: 16, 128>}]} {
    %c0_i32 = arith.constant 0 : i32
    %0 = arith.cmpi eq, %arg2, %c0_i32 : i32
    %1 = arith.extui %0 : i1 to i32
    %c0_i32_0 = arith.constant 0 : i32
    %2 = arith.cmpi ne, %1, %c0_i32_0 : i32
    scf.if %2 {
      %cst_10 = arith.constant 0.000000e+00 : f32
      %12 = vector.broadcast %cst_10 : f32 to vector<16x128xf32>
      %c0_11 = arith.constant 0 : index
      %c0_12 = arith.constant 0 : index
      %13 = vector.load %arg7[%c0_11, %c0_12] : memref<16x128xf32, #tpu.memory_space<vmem>>, vector<16x128xf32>
      tpu.vector_store %arg7[%c0_11, %c0_12], %12 {strides = array<i32>} : memref<16x128xf32, #tpu.memory_space<vmem>>, vector<16x128xf32>,
    } else {
    }
    %c0 = arith.constant 0 : index
    %c0_1 = arith.constant 0 : index
    %3 = vector.load %arg7[%c0, %c0_1] : memref<16x128xf32, #tpu.memory_space<vmem>>, vector<16x128xf32>
    %c0_2 = arith.constant 0 : index
    %c0_3 = arith.constant 0 : index
    %4 = vector.load %arg3[%c0_2, %c0_3] : memref<16x128xbf16, #tpu.memory_space<vmem>>, vector<16x128xbf16>
    %c0_4 = arith.constant 0 : index
    %c0_5 = arith.constant 0 : index
    %5 = vector.load %arg4[%c0_4, %c0_5] : memref<128x128xbf16, #tpu.memory_space<vmem>>, vector<128x128xbf16>
    %cst = arith.constant dense<0.000000e+00> : vector<16x128xf32>
    %6 = tpu.matmul %4, %5, %cst {dimension_numbers = #tpu.dot_dimension_numbers<[1], [0], [0], [1], [0, 0, 1, 1], [], []>} : vector<16x128xbf16>, vector<128x128xbf16>, vector<16x128xf32> -> vector<16x128xf32>
    %7 = arith.addf %3, %6 : vector<16x128xf32>
    %c0_6 = arith.constant 0 : index
    %c0_7 = arith.constant 0 : index
    %8 = vector.load %arg7[%c0_6, %c0_7] : memref<16x128xf32, #tpu.memory_space<vmem>>, vector<16x128xf32>
    tpu.vector_store %arg7[%c0_6, %c0_7], %7 {strides = array<i32>} : memref<16x128xf32, #tpu.memory_space<vmem>>, vector<16x128xf32>,
    %c0_i32_8 = arith.constant 0 : i32
    %9 = arith.cmpi eq, %arg2, %c0_i32_8 : i32
    %10 = arith.extui %9 : i1 to i32
    %c0_i32_9 = arith.constant 0 : i32
    %11 = arith.cmpi ne, %10, %c0_i32_9 : i32
    scf.if %11 {
      %c0_10 = arith.constant 0 : index
      %c0_11 = arith.constant 0 : index
      %12 = vector.load %arg7[%c0_10, %c0_11] : memref<16x128xf32, #tpu.memory_space<vmem>>, vector<16x128xf32>
      %c0_12 = arith.constant 0 : index
      %c0_13 = arith.constant 0 : index
      %13 = vector.load %arg5[%c0_12, %c0_13] : memref<1x128xf32, #tpu.memory_space<vmem>>, vector<1x128xf32>
      %14 = vector.broadcast %13 : vector<1x128xf32> to vector<16x128xf32>
      %15 = arith.addf %12, %14 : vector<16x128xf32>
      %c0_14 = arith.constant 0 : index
      %c0_15 = arith.constant 0 : index
      %16 = vector.load %arg6[%c0_14, %c0_15] : memref<16x128xf32, #tpu.memory_space<vmem>>, vector<16x128xf32>
      tpu.vector_store %arg6[%c0_14, %c0_15], %15 {strides = array<i32>} : memref<16x128xf32, #tpu.memory_space<vmem>>, vector<16x128xf32>,
    } else {
    }
    return
  }
  func.func @transform_0(%arg0: i32, %arg1: i32, %arg2: i32) -> (i32, i32) {
    %c0_i32 = arith.constant 0 : i32
    return %arg0, %arg2 : i32, i32
  }
  func.func @transform_1(%arg0: i32, %arg1: i32, %arg2: i32) -> (i32, i32) {
    %c0_i32 = arith.constant 0 : i32
    return %arg2, %arg1 : i32, i32
  }
  func.func @transform_2(%arg0: i32, %arg1: i32, %arg2: i32) -> (i32, i32) {
    %c0_i32 = arith.constant 0 : i32
    %c0_i32_0 = arith.constant 0 : i32
    return %c0_i32, %arg1 : i32, i32
  }
  func.func @transform_3(%arg0: i32, %arg1: i32, %arg2: i32) -> (i32, i32) {
    %c0_i32 = arith.constant 0 : i32
    return %arg0, %arg1 : i32, i32
  }
}

</mosaic_0001>

<bundles_post_ra>
// kernel: tpu_custom_call.1
= control target key start
LH: loop header
LB: loop body
LE: loop exit
PB: predicated region body
PF: predicated region fallthrough
CT: control target
= control target key end

     0   :  { %8 = vsyncpa [#allocation4], 0  ;;  %s400_s0 = inlined_call_operand.hbm [shape: bf16[16,128], index: 0, kind: input, shape index: {}]   ;;  %s401_s1 = inlined_call_operand.hbm [shape: bf16[128,128], index: 1, kind: input, shape index: {}]   ;;  %s402_s2 = inlined_call_operand.vmem [shape: f32[1,128], index: 2, kind: input, shape index: {}]   ;;  %s403_s3 = inlined_call_operand.hbm [shape: f32[16,128], index: 3, kind: output, shape index: {}]  }
   0x1   :  { %9 = vsyncpa [#allocation7], 0 }
   0x2   :  { %10 = vsyncpa [#allocation5], 0  ;;  %s332_s12 = smov [#allocation3]   ;;  %s260_s16 = scalar_lea.hbm %s400_s0, 128 }
   0x3   :  { %s16_s13 = sshll.u32 %s332_s12, 4  ;;  %p261_p0 = scmp.ne.s32.totalorder %s400_s0, %s260_s16  ;;  %s17_s13 = int_to_ptr.vmem [resolvable:$true] %s16_s13 }
   0x4   :  { %p264_p1 = scmp.lt.u32.totalorder %s260_s16, %s400_s0 }
   0x6   :  { %p266_p2 = pnand %p264_p1, %p261_p0 }
   0x8   :  { %269 = shalt.err (!%p266_p2)
}
   0x9   :  { %s270_s21 = scalar_lea.vmem %s17_s13, 128  ;;  %p275_p4 = scmp.lt.s32.totalorder %s17_s13, %s17_s13 }
   0xa   :  { %p271_p3 = scmp.ne.s32.totalorder %s17_s13, %s270_s21  ;;  %p276_p5 = scmp.lt.s32.totalorder %s270_s21, %s270_s21 }
   0xc   :  { %p277_p6 = por %p276_p5, %p275_p4 }
   0xe   :  { %p278_p7 = pnand %p277_p6, %p271_p3 }
  0x10   :  { %281 = shalt.err (!%p278_p7)
}
  0x11   :  { %s333_s22 = smov 64   ;;  %s334_s23 = smov 4  }
  0x12   :  { %22 = dma.hbm_to_vmem [thread:$0]  %s400_s0, 128, %s17_s13, [#allocation4], %s333_s22, %s333_s22, %s334_s23  }
  0x13   :  { %s335_s26 = smov [#allocation6]   ;;  %s282_s30 = scalar_lea.hbm %s401_s1, 1024 }
  0x14   :  { %s28_s27 = sshll.u32 %s335_s26, 4  ;;  %p283_p8 = scmp.ne.s32.totalorder %s401_s1, %s282_s30  ;;  %s29_s27 = int_to_ptr.vmem [resolvable:$true] %s28_s27 }
  0x15   :  { %p286_p9 = scmp.lt.u32.totalorder %s282_s30, %s401_s1 }
  0x17   :  { %p288_p10 = pnand %p286_p9, %p283_p8 }
  0x19   :  { %291 = shalt.err (!%p288_p10)
}
  0x1a   :  { %s292_s8 = scalar_lea.vmem %s29_s27, 1024  ;;  %p297_p12 = scmp.lt.s32.totalorder %s29_s27, %s29_s27 }
  0x1b   :  { %p293_p11 = scmp.ne.s32.totalorder %s29_s27, %s292_s8  ;;  %p298_p13 = scmp.lt.s32.totalorder %s292_s8, %s292_s8 }
  0x1d   :  { %p299_p0 = por %p298_p13, %p297_p12 }
  0x1f   :  { %p300_p1 = pnand %p299_p0, %p293_p11 }
  0x21   :  { %303 = shalt.err (!%p300_p1)
}
  0x22   :  { %34 = dma.hbm_to_vmem [thread:$0]  %s401_s1, 1024, %s29_s27, [#allocation7], %s333_s22, %s333_s22, %s334_s23  }
  0x23   :  { %326 = dma.done.wait [#allocation4], 128  }
  0x24   :  { %327 = vsyncadd [#allocation4], 4294967168 }
  0x25   :  { %328 = dma.done.wait [#allocation7], 1024  }
  0x26   :  { %329 = vsyncadd [#allocation7], 4294966272  ;;  %v336_v0 = vmov 0.0   ;;  %vm337_vm0 = vmmov 0   ;;  %v251_v1 = vld [vmem:[#allocation6] sm:$0xff]   ;;  %v252_v2 = vld [vmem:[#allocation6 + $0x8] sm:$0xff]  }
  0x27   :  { %222 = vmatprep.subr.bf16.mxu0 %v336_v0  ;;  %238 = vmatprep.mubr.msk.bf16.mxu0 %vm337_vm0, %v336_v0  ;;  %v253_v3 = vld [vmem:[#allocation6 + $0x10] sm:$0xff]   ;;  %v254_v4 = vld [vmem:[#allocation6 + $0x18] sm:$0xff]   ;;  %v255_v5 = vld [vmem:[#allocation6 + $0x20] sm:$0xff]   ;;  %s338_s11 = smov [#allocation8]  }
  0x28   :  { %223 = vmatpush3.bf16.msra.mxu0 %v251_v1  ;;  %v256_v6 = vld [vmem:[#allocation6 + $0x28] sm:$0xff]   ;;  %v257_v7 = vld [vmem:[#allocation6 + $0x30] sm:$0xff]   ;;  %v258_v8 = vld [vmem:[#allocation6 + $0x38] sm:$0xff]   ;;  %s190_s12 = sshll.u32 %s338_s11, 4  ;;  %s191_s12 = int_to_ptr.vmem [resolvable:$true] %s190_s12 }
  0x29   :  { %224 = vmatprep.subr.bf16.mxu0 %v336_v0  ;;  %v259_v9 = vld [vmem:[#allocation3] sm:$0xff]   ;;  %s304_s13 = scalar_lea.vmem %s191_s12, 256  ;;  %p309_p3 = scmp.lt.s32.totalorder %s191_s12, %s191_s12 }
  0x2a   :  { %v212_v10 = vld [vmem:[%s402_s2] ss:$0 sm:$0xff]  ;;  %p305_p2 = scmp.ne.s32.totalorder %s191_s12, %s304_s13  ;;  %p310_p4 = scmp.lt.s32.totalorder %s304_s13, %s304_s13 }
  0x2c   :  { %225 = vmatpush3.bf16.msra.mxu0 %v252_v2  ;;  %p311_p5 = por %p310_p4, %p309_p3 }
  0x2d   :  { %226 = vmatprep.subr.bf16.mxu0 %v336_v0 }
  0x2e   :  { %p312_p6 = pnand %p311_p5, %p305_p2 }
  0x30   :  { %227 = vmatpush3.bf16.msra.mxu0 %v253_v3 }
  0x31   :  { %228 = vmatprep.subr.bf16.mxu0 %v336_v0 }
  0x34   :  { %229 = vmatpush3.bf16.msra.mxu0 %v254_v4 }
  0x35   :  { %230 = vmatprep.subr.bf16.mxu0 %v336_v0 }
  0x38   :  { %231 = vmatpush3.bf16.msra.mxu0 %v255_v5 }
  0x39   :  { %232 = vmatprep.subr.bf16.mxu0 %v336_v0 }
  0x3c   :  { %233 = vmatpush3.bf16.msra.mxu0 %v256_v6 }
  0x3d   :  { %234 = vmatprep.subr.bf16.mxu0 %v336_v0 }
  0x40   :  { %235 = vmatpush3.bf16.msra.mxu0 %v257_v7 }
  0x41   :  { %236 = vmatprep.subr.bf16.mxu0 %v336_v0 }
  0x44   :  { %237 = vmatpush3.bf16.msra.mxu0 %v258_v8 }
  0x47   :  { %239 = vmatmul.mubr.bf16.vlgmr.msra.gmra.mrb[0].mxu0 %v259_v9 }
 0x11a   :  { %v158_v11 = vpop.f32.mrb[0].mxu0 }
 0x11b   :  { %v181_v12 = vadd.f32 %v212_v10, %v158_v11  ;;  %v240_v13 = vpop.f32.mrb[1].mxu0 }
 0x11c   :  { %v161_v14 = vpop.f32.mrb[2].mxu0 }
 0x11d   :  { %183 = vst [vmem:[#allocation8] sm:$0xff] %v181_v12  ;;  %v182_v15 = vadd.f32 %v212_v10, %v161_v14  ;;  %v241_v16 = vpop.f32.mrb[3].mxu0 }
 0x11f   :  { %184 = vst [vmem:[#allocation8 + $0x8] sm:$0xff] %v182_v15 }
 0x120   :  { %315 = shalt.err (!%p312_p6)
}
 0x121   :  { %s316_s15 = scalar_lea.hbm %s403_s3, 256 }
 0x122   :  { %p317_p7 = scmp.ne.s32.totalorder %s403_s3, %s316_s15  ;;  %p320_p8 = scmp.lt.u32.totalorder %s316_s15, %s403_s3 }
 0x124   :  { %p322_p9 = pnand %p320_p8, %p317_p7 }
 0x126   :  { %325 = shalt.err (!%p322_p9)
}
 0x127   :  { %s339_s20 = smov 128   ;;  %s340_s21 = smov 8  }
 0x128   :  { %196 = dma.vmem_to_hbm [thread:$0]  %s191_s12, 256, %s403_s3, [#allocation5], %s339_s20, %s339_s20, %s340_s21  }
 0x129   :  { %330 = dma.done.wait [#allocation5], 256  }
 0x12a   :  { %331 = vsyncadd [#allocation5], 4294967040 }
 0x12b   :  { %200 = vsyncpa [#allocation4], 1 }
 0x12c   :  { %201 = vsyncpa [#allocation7], 1 }
 0x12d   :  { %202 = vsyncpa [#allocation5], 1 }

</bundles_post_ra>
